<compile_context>
chip_gen: v7x
topology: tpu7x:2x2x1
jax: 0.10.0
libtpu: 0.0.40
codegen_flags: <defaults>
</compile_context>

<pallas_src>
import jax
import jax.numpy as jnp
from jax.experimental import pallas as pl
from jax.experimental.pallas import tpu as pltpu


def _classifier_kernel(x_ref, w1_ref, b1_ref, w2_ref, b2_ref, o_ref):
    # Layer 1 on the MXU: cast to bf16 here (free VPU work hidden under the
    # input DMA) and accumulate in f32.
    x = x_ref[...].astype(jnp.bfloat16)                              # (TB, F)
    h = jnp.dot(x, w1_ref[...], preferred_element_type=jnp.float32)  # (TB, 64)
    h = h + b1_ref[...]                                              # (1, 64) bias

    # sigmoid(h) = 0.5*tanh(0.5*h) + 0.5 : one EUP push per vreg; the mul/add
    # land on otherwise-idle VALU slots.
    s = 0.5 * jnp.tanh(0.5 * h) + 0.5

    # Layer 2 (64 -> 1) as VPU multiply + lane reduction (MXU left alone).
    # NOTE: padded/garbage rows of a partial last tile also run through this
    # math; that is harmless on TPU and they are sliced away in the wrapper —
    # do not "fix" it with a mask.
    p = jnp.sum(s * w2_ref[...], axis=-1) + b2_ref[0]                # (TB,)

    # Lane-dense output: one unmasked (1, TB) row store per tile.
    o_ref[...] = p.reshape(1, -1).astype(o_ref.dtype)


def target_classifier_forward(emb, w1, b1, w2, b2, *, block_b=8192):
    """emb: (B, ...) flattened to (B, 2*final_out_channels). Returns (B, 1) f32.

    w1: (64, 2*C), b1: (64,), w2: (1, 64), b2: (1,)  -- PyTorch Linear layouts.
    """
    B = emb.shape[0]
    emb_flat = emb.reshape(B, -1)                 # glue reshape (plain JAX), stays f32
    F = emb_flat.shape[1]                         # 2 * final_out_channels
    H = w1.shape[0]                               # 64

    # Small resident operands (weights/biases); the (F,H) weight is bf16 for the MXU.
    w1_t = w1.T.astype(jnp.bfloat16)              # (F, H)
    b1_r = b1.reshape(1, H).astype(jnp.float32)   # (1, H)
    w2_r = w2.reshape(1, H).astype(jnp.float32)   # (1, H) row for the VPU reduce
    b2_s = b2.reshape(1).astype(jnp.float32)      # scalar in SMEM

    # Batch tile. 8192 keeps the lane-padded (tb,128) f32 input double-buffer
    # at ~8 MiB (fits v5e's 16 MiB scoped-VMEM default); raise block_b (plus
    # vmem_limit_bytes) on v6e/v7x if this head ever dominates.
    tb = min(block_b, B)
    # Megacore (v7x): give large batches at least 2 grid steps.
    if B > 1024 and (B + tb - 1) // tb < 2:
        tb = max(8, (((B + 1) // 2 + 7) // 8) * 8)
    num_tiles = (B + tb - 1) // tb

    out = pl.pallas_call(
        _classifier_kernel,
        out_shape=jax.ShapeDtypeStruct((num_tiles, tb), jnp.float32),
        grid=(num_tiles,),
        in_specs=[
            pl.BlockSpec((tb, F), lambda i: (i, 0)),   # batch-tiled f32 input
            pl.BlockSpec((F, H), lambda i: (0, 0)),    # resident W1 (bf16)
            pl.BlockSpec((1, H), lambda i: (0, 0)),    # resident b1 row
            pl.BlockSpec((1, H), lambda i: (0, 0)),    # resident w2 row
            pl.BlockSpec(memory_space=pltpu.MemorySpace.SMEM),  # b2 scalar
        ],
        out_specs=pl.BlockSpec((1, tb), lambda i: (i, 0)),      # lane-dense row
        compiler_params=pltpu.CompilerParams(
            dimension_semantics=("parallel",)),        # megacore sharding (v7x)
    )(emb_flat, w1_t, b1_r, w2_r, b2_s)

    # Un-pad and restore the (B, 1) column shape of the PyTorch module.
    return out.reshape(-1)[:B].reshape(B, 1)


if __name__ == "__main__":
    # configs['final_out_channels'] = 16 -> in_features = 32, hidden = 64, out = 1
    final_out_channels = 16
    in_features = 2 * final_out_channels
    hidden = 64
    batch = 2

    key = jax.random.PRNGKey(0)
    k_emb, k_w1, k_b1, k_w2, k_b2 = jax.random.split(key, 5)

    # input "emb" as it would come out of the encoder: (B, 2, final_out_channels)
    emb = jax.random.normal(k_emb, (batch, 2, final_out_channels), dtype=jnp.float32)

    # deterministic parameter init (PyTorch Linear shapes: (out, in) and (out,))
    bound1 = 1.0 / (in_features ** 0.5)
    w1 = jax.random.uniform(k_w1, (hidden, in_features), jnp.float32, -bound1, bound1)
    b1 = jax.random.uniform(k_b1, (hidden,), jnp.float32, -bound1, bound1)
    bound2 = 1.0 / (hidden ** 0.5)
    w2 = jax.random.uniform(k_w2, (1, hidden), jnp.float32, -bound2, bound2)
    b2 = jax.random.uniform(k_b2, (1,), jnp.float32, -bound2, bound2)

    pred = target_classifier_forward(emb, w1, b1, w2, b2)
    pred = jax.block_until_ready(pred)

    # Reference check in plain JAX (full f32). Tolerance is loosened only for
    # the bf16 MXU inputs (the tanh-form sigmoid is numerically exact).
    emb_flat = emb.reshape(batch, -1)
    ref = jax.nn.sigmoid(emb_flat @ w1.T + b1) @ w2.T + b2
    assert pred.shape == (batch, 1)
    assert jnp.allclose(pred, ref, atol=2e-2, rtol=2e-2), (pred, ref)

    print("KERNEL_OK")
</pallas_src>

<mosaic_0001>
module attributes {stable_mosaic.version = 11 : i64} {
  func.func @_classifier_kernel(%arg0: i32, %arg1: memref<2x32xf32, #tpu.memory_space<vmem>>, %arg2: memref<32x64xbf16, #tpu.memory_space<vmem>>, %arg3: memref<1x64xf32, #tpu.memory_space<vmem>>, %arg4: memref<1x64xf32, #tpu.memory_space<vmem>>, %arg5: memref<1xf32, #tpu.memory_space<smem>>, %arg6: memref<1x2xf32, #tpu.memory_space<vmem>>) attributes {dimension_semantics = [#tpu.dimension_semantics<parallel>], iteration_bounds = array<i64: 1>, scalar_prefetch = 0 : i64, scratch_operands = 0 : i64, tpu.core_type = #tpu.core_type<tc>, window_params = [{transform_indices = @transform_0, window_bounds = array<i64: 2, 32>}, {pipeline_mode = #tpu.pipeline_mode<synchronous>, transform_indices = @transform_1, window_bounds = array<i64: 32, 64>}, {pipeline_mode = #tpu.pipeline_mode<synchronous>, transform_indices = @transform_2, window_bounds = array<i64: 1, 64>}, {pipeline_mode = #tpu.pipeline_mode<synchronous>, transform_indices = @transform_3, window_bounds = array<i64: 1, 64>}, {transform_indices = @transform_4, window_bounds = array<i64: 1>}, {transform_indices = @transform_5, window_bounds = array<i64: 1, 2>}]} {
    %c0 = arith.constant 0 : index
    %c0_0 = arith.constant 0 : index
    %0 = vector.load %arg1[%c0, %c0_0] : memref<2x32xf32, #tpu.memory_space<vmem>>, vector<2x32xf32>
    %1 = arith.truncf %0 : vector<2x32xf32> to vector<2x32xbf16>
    %c0_1 = arith.constant 0 : index
    %c0_2 = arith.constant 0 : index
    %2 = vector.load %arg2[%c0_1, %c0_2] : memref<32x64xbf16, #tpu.memory_space<vmem>>, vector<32x64xbf16>
    %cst = arith.constant dense<0.000000e+00> : vector<2x64xf32>
    %3 = tpu.matmul %1, %2, %cst {dimension_numbers = #tpu.dot_dimension_numbers<[1], [0], [0], [1], [0, 0, 1, 1], [], []>} : vector<2x32xbf16>, vector<32x64xbf16>, vector<2x64xf32> -> vector<2x64xf32>
    %c0_3 = arith.constant 0 : index
    %c0_4 = arith.constant 0 : index
    %4 = vector.load %arg3[%c0_3, %c0_4] : memref<1x64xf32, #tpu.memory_space<vmem>>, vector<1x64xf32>
    %5 = vector.broadcast %4 : vector<1x64xf32> to vector<2x64xf32>
    %6 = arith.addf %3, %5 : vector<2x64xf32>
    %cst_5 = arith.constant 5.000000e-01 : f32
    %7 = vector.broadcast %cst_5 : f32 to vector<2x64xf32>
    %8 = arith.mulf %7, %6 : vector<2x64xf32>
    %9 = math.tanh %8 : vector<2x64xf32>
    %cst_6 = arith.constant 5.000000e-01 : f32
    %10 = vector.broadcast %cst_6 : f32 to vector<2x64xf32>
    %11 = arith.mulf %10, %9 : vector<2x64xf32>
    %cst_7 = arith.constant 5.000000e-01 : f32
    %12 = vector.broadcast %cst_7 : f32 to vector<2x64xf32>
    %13 = arith.addf %11, %12 : vector<2x64xf32>
    %c0_8 = arith.constant 0 : index
    %c0_9 = arith.constant 0 : index
    %14 = vector.load %arg4[%c0_8, %c0_9] : memref<1x64xf32, #tpu.memory_space<vmem>>, vector<1x64xf32>
    %15 = vector.broadcast %14 : vector<1x64xf32> to vector<2x64xf32>
    %16 = arith.mulf %13, %15 : vector<2x64xf32>
    %cst_10 = arith.constant dense<0.000000e+00> : vector<2xf32>
    %17 = vector.multi_reduction <add>, %16, %cst_10 [1] : vector<2x64xf32> to vector<2xf32>
    %c0_11 = arith.constant 0 : index
    %18 = memref.load %arg5[%c0_11] : memref<1xf32, #tpu.memory_space<smem>>
    %19 = vector.broadcast %18 : f32 to vector<2xf32>
    %20 = arith.addf %17, %19 : vector<2xf32>
    %21 = vector.shape_cast %20 : vector<2xf32> to vector<1x2xf32>
    %c0_12 = arith.constant 0 : index
    %c0_13 = arith.constant 0 : index
    %22 = vector.load %arg6[%c0_12, %c0_13] : memref<1x2xf32, #tpu.memory_space<vmem>>, vector<1x2xf32>
    tpu.vector_store %arg6[%c0_12, %c0_13], %21 {strides = array<i32>} : memref<1x2xf32, #tpu.memory_space<vmem>>, vector<1x2xf32>,
    return
  }
  func.func @transform_0(%arg0: i32) -> (i32, i32) {
    %c0_i32 = arith.constant 0 : i32
    %c0_i32_0 = arith.constant 0 : i32
    return %arg0, %c0_i32 : i32, i32
  }
  func.func @transform_1(%arg0: i32) -> (i32, i32) {
    %c0_i32 = arith.constant 0 : i32
    %c0_i32_0 = arith.constant 0 : i32
    %c0_i32_1 = arith.constant 0 : i32
    return %c0_i32, %c0_i32_0 : i32, i32
  }
  func.func @transform_2(%arg0: i32) -> (i32, i32) {
    %c0_i32 = arith.constant 0 : i32
    %c0_i32_0 = arith.constant 0 : i32
    %c0_i32_1 = arith.constant 0 : i32
    return %c0_i32, %c0_i32_0 : i32, i32
  }
  func.func @transform_3(%arg0: i32) -> (i32, i32) {
    %c0_i32 = arith.constant 0 : i32
    %c0_i32_0 = arith.constant 0 : i32
    %c0_i32_1 = arith.constant 0 : i32
    return %c0_i32, %c0_i32_0 : i32, i32
  }
  func.func @transform_4(%arg0: i32) -> i32 {
    %c0_i32 = arith.constant 0 : i32
    %c0_i32_0 = arith.constant 0 : i32
    return %c0_i32 : i32
  }
  func.func @transform_5(%arg0: i32) -> (i32, i32) {
    %c0_i32 = arith.constant 0 : i32
    %c0_i32_0 = arith.constant 0 : i32
    return %arg0, %c0_i32 : i32, i32
  }
}

</mosaic_0001>

<bundles_post_ra>
// kernel: tpu_custom_call.1
= control target key start
LH: loop header
LB: loop body
LE: loop exit
PB: predicated region body
PF: predicated region fallthrough
CT: control target
= control target key end

     0   :  { %11 = vsyncpa [#allocation4], 0  ;;  %s296_s0 = inlined_call_operand.vmem [shape: f32[2,32], index: 0, kind: input, shape index: {}]   ;;  %s297_s1 = inlined_call_operand.hbm [shape: bf16[32,64], index: 1, kind: input, shape index: {}]   ;;  %s298_s2 = inlined_call_operand.vmem [shape: f32[1,64], index: 2, kind: input, shape index: {}]   ;;  %s299_s3 = inlined_call_operand.vmem [shape: f32[1,64], index: 3, kind: input, shape index: {}]   ;;  %s300_s4 = inlined_call_operand.<no memory space> [shape: f32[1], index: 4, kind: input, shape index: {}]   ;;  %s301_s5 = inlined_call_operand.hbm [shape: f32[1,2], index: 5, kind: output, shape index: {}]  }
   0x1   :  { %12 = vsyncpa [#allocation5], 0  ;;  %s224_s18 = smov [#allocation3]   ;;  %s176_s22 = scalar_lea.hbm %s297_s1, 256 }
   0x2   :  { %s20_s19 = sshll.u32 %s224_s18, 4  ;;  %p177_p0 = scmp.ne.s32.totalorder %s297_s1, %s176_s22  ;;  %s21_s19 = int_to_ptr.vmem [resolvable:$true] %s20_s19 }
   0x3   :  { %p180_p1 = scmp.lt.u32.totalorder %s176_s22, %s297_s1 }
   0x5   :  { %p182_p2 = pnand %p180_p1, %p177_p0 }
   0x7   :  { %185 = shalt.err (!%p182_p2)
}
   0x8   :  { %s186_s27 = scalar_lea.vmem %s21_s19, 256  ;;  %p191_p4 = scmp.lt.s32.totalorder %s21_s19, %s21_s19 }
   0x9   :  { %p187_p3 = scmp.ne.s32.totalorder %s21_s19, %s186_s27  ;;  %p192_p5 = scmp.lt.s32.totalorder %s186_s27, %s186_s27 }
   0xb   :  { %p193_p6 = por %p192_p5, %p191_p4 }
   0xd   :  { %p194_p7 = pnand %p193_p6, %p187_p3 }
   0xf   :  { %197 = shalt.err (!%p194_p7)
}
  0x10   :  { %s225_s28 = smov 64   ;;  %s226_s29 = smov 4  }
  0x11   :  { %26 = dma.hbm_to_vmem [thread:$0]  %s297_s1, 256, %s21_s19, [#allocation4], %s225_s28, %s225_s28, %s226_s29  }
  0x12   :  { %220 = dma.done.wait [#allocation4], 256  }
  0x13   :  { %221 = vsyncadd [#allocation4], 4294967040  ;;  %v227_v0 = vmov 0.0   ;;  %vm228_vm0 = vmmov 0   ;;  %v172_v1 = vld [vmem:[#allocation3] sm:$0xff]   ;;  %v173_v2 = vld [vmem:[#allocation3 + $0x8] sm:$0xff]   ;;  %v126_v18 = vlaneseq  ;;  %v123_v21 = vstv %s300_s4 }
  0x14   :  { %158 = vmatprep.subr.bf16.mxu0 %v227_v0  ;;  %162 = vmatprep.mubr.msk.bf16.mxu0 %vm228_vm0, %v227_v0  ;;  %v37_v3 = vld [vmem:[%s296_s0] sm:$0x3]  ;;  %vm62_vm1 = vcmask 261120   ;;  %vm118_vm2 = vcmask 517120   ;;  %s229_s12 = smov [#allocation6]   ;;  %vm133_vm3 = vcmask 8192  }
  0x15   :  { %159 = vmatpush3.bf16.msra.mxu0 %v172_v1  ;;  %v38_v4 = vpack.c.bf16 %v37_v3, %v37_v3  ;;  %v150_v5 = vld [vmem:[%s298_s2] ss:$0 sm:$0xff]  ;;  %v127_v19 = vand.u32 127, %v126_v18  ;;  %v129_v20 = vshrl.u32 %v126_v18, 7  ;;  %s141_s13 = sshll.u32 %s229_s12, 4  ;;  %s142_s13 = int_to_ptr.vmem [resolvable:$true] %s141_s13 }
  0x16   :  { %160 = vmatprep.subr.bf16.mxu0 %v227_v0  ;;  %v154_v14 = vld [vmem:[%s299_s3] ss:$0 sm:$0xff]  ;;  %s198_s3 = scalar_lea.vmem %s142_s13, 16  ;;  %s202_s14 = scalar_lea.vmem %s142_s13, 32 }
  0x17   :  { %v130_v22 = vsub.s32 %v127_v19, %v129_v20  ;;  %p199_p8 = scmp.ne.s32.totalorder %s142_s13, %s198_s3  ;;  %p203_p9 = scmp.lt.s32.totalorder %s142_s13, %s142_s13 }
  0x18   :  { %p204_p10 = scmp.lt.s32.totalorder %s202_s14, %s198_s3 }
  0x19   :  { %161 = vmatpush3.bf16.msra.mxu0 %v173_v2 }
  0x1a   :  { %p205_p11 = por %p204_p10, %p203_p9 }
  0x1c   :  { %163 = vmatmul.mubr.msk.bf16.vlgmr.msra.gmra.mrb[0].mxu0 %vm62_vm1, %v38_v4  ;;  %p206_p12 = pnand %p205_p11, %p199_p8 }
  0xef   :  { %v100_v6 = vpop.f32.mrb[0].mxu0 }
  0xf0   :  { %v101_v7 = vadd.f32 %v150_v5, %v100_v6  ;;  %v164_v8 = vpop.f32.mrb[1].mxu0 }
  0xf1   :  { %v103_v9 = vpop.f32.mrb[2].mxu0 }
  0xf2   :  { %v106_v10 = vmul.f32 0.5, %v101_v7  ;;  %v165_v11 = vpop.f32.mrb[3].mxu0 }
  0xf4   :  { %174 = vtanh.f32 %v106_v10 }
  0xfe   :  { %v175_v12 = vpop.eup %174 }
  0xff   :  { %v108_v13 = vmul.f32 0.5, %v175_v12 }
 0x101   :  { %v109_v15 = vadd.f32 0.5, %v108_v13 }
 0x103   :  { %v117_v16 = vmul.f32 %v154_v14, %v109_v15 }
 0x105   :  { %v119_v17 = vsel %vm118_vm2, %v117_v16, 0.0 }
 0x106   :  { %120 = vadd.xlane.f32.xlu0 %v119_v17 }
 0x193   :  { %v121_v23 = vpop.xlane.xlu0 %120 }
 0x194   :  { %v124_v24 = vadd.f32 %v123_v21, %v121_v23 }
 0x196   :  { %v131_v25 = vrot.slane %v124_v24, %v130_v22 }
 0x198   :  { %134 = vst.msk [vmem:[#allocation6] sm:$0x1] %vm133_vm3, %v131_v25 }
 0x199   :  { %209 = shalt.err (!%p206_p12)
}
 0x19a   :  { %s210_s4 = scalar_lea.hbm %s301_s5, 16 }
 0x19b   :  { %p211_p13 = scmp.ne.s32.totalorder %s301_s5, %s210_s4  ;;  %p214_p0 = scmp.lt.u32.totalorder %s210_s4, %s301_s5 }
 0x19d   :  { %p216_p1 = pnand %p214_p0, %p211_p13 }
 0x19f   :  { %219 = shalt.err (!%p216_p1)
}
 0x1a0   :  { %144 = dma.vmem_to_hbm [thread:$0]  %s142_s13, 16, %s301_s5, [#allocation5]  }
 0x1a1   :  { %222 = dma.done.wait [#allocation5], 16  }
 0x1a2   :  { %223 = vsyncadd [#allocation5], 4294967280 }
 0x1a3   :  { %148 = vsyncpa [#allocation4], 1 }
 0x1a4   :  { %149 = vsyncpa [#allocation5], 1 }

</bundles_post_ra>
